<compile_context>
chip_gen: v5e
topology: v5e:2x2
jax: 0.10.0
libtpu: 0.0.40
codegen_flags: <defaults>
</compile_context>

<pallas_src>
import functools

import jax
import jax.numpy as jnp
from jax.experimental import pallas as pl
from jax.experimental.pallas import tpu as pltpu


def _mha_kernel(x_ref, wqkv_ref, bqkv_ref, wo_ref, bo_ref,
                out_ref, qk_ref, acc_ref, *, n_head: int, head_dim: int):
    h = pl.program_id(1)

    @pl.when(h == 0)
    def _init():
        acc_ref[...] = jnp.zeros_like(acc_ref)

    x = x_ref[0]                                              # (T, D)

    # Fused per-head Q/K/V projection: one (T, D) x (D, 3*hd) MXU matmul.
    # Attention scale is already folded into the Q columns / bias host-side.
    qkv = jnp.dot(x, wqkv_ref[0], preferred_element_type=jnp.float32)
    qkv = (qkv + bqkv_ref[0, 0]).astype(x.dtype)              # (T, 3*hd)

    qh = qkv[:, :head_dim]
    kh = qkv[:, head_dim:2 * head_dim]
    vh = qkv[:, 2 * head_dim:]

    # Scores q @ k^T without transposing k (contract last dims).
    s = jax.lax.dot_general(qh, kh, (((1,), (1,)), ((), ())),
                            preferred_element_type=jnp.float32)   # (T, T)
    qk_ref[0, 0] = s                                          # pre-softmax scores, f32

    # Softmax with divide-free denominator (EUP approx reciprocal).
    m = jnp.max(s, axis=-1, keepdims=True)
    p = jnp.exp(s - m)
    l = jnp.sum(p, axis=-1, keepdims=True)
    w = (p * pl.reciprocal(l, approx=True)).astype(x.dtype)   # (T, T)

    head_out = jnp.dot(w, vh, preferred_element_type=jnp.float32)  # (T, hd)

    # Per-head slice of the (pre-transposed) output projection, accumulated —
    # no concatenate of head outputs, no in-kernel weight transpose.
    acc_ref[...] += jnp.dot(head_out.astype(x.dtype), wo_ref[0],
                            preferred_element_type=jnp.float32)    # (T, D)

    @pl.when(h == n_head - 1)
    def _finalize():
        out_ref[0] = (acc_ref[...] + bo_ref[0]).astype(out_ref.dtype)


def multi_head_attention(x, wq, bq, wk, wv, bv, wo, bo, *, n_head: int):
    """x: (B, T, D). Weights are PyTorch-layout (out_features, in_features)."""
    B, T, D = x.shape
    assert D % n_head == 0
    hd = D // n_head
    scale = float(hd) ** -0.5          # == (hd**-0.25) applied to both q and k

    bq = bq.reshape(D)
    bv = bv.reshape(D)
    bo2 = bo.reshape(1, D)

    # Host-side packing: pre-transpose (y = x @ W_t), fold the attention scale
    # into the query projection, and split into per-head slabs so the kernel's
    # BlockSpec does the head selection.
    def head_split(w_t):               # (D, D_out) -> (H, D, hd)
        return w_t.reshape(D, n_head, hd).transpose(1, 0, 2)

    wqkv = jnp.concatenate(
        [head_split((wq * scale).T), head_split(wk.T), head_split(wv.T)],
        axis=-1)                                               # (H, D, 3*hd)
    bqkv = jnp.concatenate(
        [(bq * scale).reshape(n_head, hd),
         jnp.zeros((n_head, hd), bq.dtype),                    # key has no bias
         bv.reshape(n_head, hd)],
        axis=-1).reshape(n_head, 1, 3 * hd)                    # (H, 1, 3*hd)
    wo_h = wo.T.reshape(n_head, hd, D)                         # (H, hd, D)

    kernel = functools.partial(_mha_kernel, n_head=n_head, head_dim=hd)

    out, qk = pl.pallas_call(
        kernel,
        out_shape=(
            jax.ShapeDtypeStruct((B, T, D), x.dtype),            # self.out(wv)
            jax.ShapeDtypeStruct((B, n_head, T, T), jnp.float32),  # qk (detached)
        ),
        grid_spec=pltpu.PrefetchScalarGridSpec(
            num_scalar_prefetch=0,
            grid=(B, n_head),
            in_specs=[
                pl.BlockSpec((1, T, D), lambda b, h: (b, 0, 0)),        # x (resident over heads)
                pl.BlockSpec((1, D, 3 * hd), lambda b, h: (h, 0, 0)),   # packed per-head Wqkv^T
                pl.BlockSpec((1, 1, 3 * hd), lambda b, h: (h, 0, 0)),   # packed per-head bias
                pl.BlockSpec((1, hd, D), lambda b, h: (h, 0, 0)),       # per-head rows of Wo^T
                pl.BlockSpec((1, D), lambda b, h: (0, 0)),              # output bias
            ],
            out_specs=[
                pl.BlockSpec((1, T, D), lambda b, h: (b, 0, 0)),        # out (acc over heads)
                pl.BlockSpec((1, 1, T, T), lambda b, h: (b, h, 0, 0)),  # per-head qk block
            ],
            scratch_shapes=[pltpu.VMEM((T, D), jnp.float32)],           # output-proj accumulator
        ),
        compiler_params=pltpu.CompilerParams(
            dimension_semantics=("parallel", "arbitrary"),
            vmem_limit_bytes=48 * 1024 * 1024,
        ),
    )(x, wqkv, bqkv, wo_h, bo2)
    return out, qk


def _reference(x, wq, bq, wk, wv, bv, wo, bo, n_head):
    B, T, D = x.shape
    hd = D // n_head
    scale = (D // n_head) ** (-0.25)
    q = x @ wq.T + bq
    k = x @ wk.T
    v = x @ wv.T + bv
    qh = q.reshape(B, T, n_head, hd).transpose(0, 2, 1, 3) * scale
    kh = k.reshape(B, T, n_head, hd).transpose(0, 2, 3, 1) * scale
    vh = v.reshape(B, T, n_head, hd).transpose(0, 2, 1, 3)
    qk = (qh @ kh).astype(jnp.float32)
    w = jax.nn.softmax(qk, axis=-1).astype(q.dtype)
    wv_ = (w @ vh).transpose(0, 2, 1, 3).reshape(B, T, D)
    return wv_ @ wo.T + bo, qk


if __name__ == "__main__":
    # Small shapes consistent with the module: batch=2, seq=8, n_state=32, n_head=4
    B, T, D, H = 2, 8, 32, 4
    key = jax.random.PRNGKey(0)
    keys = jax.random.split(key, 8)

    x = jax.random.normal(keys[0], (B, T, D), dtype=jnp.float32)
    wq = jax.random.normal(keys[1], (D, D), dtype=jnp.float32) * 0.1
    bq = jax.random.normal(keys[2], (D,), dtype=jnp.float32) * 0.1
    wk = jax.random.normal(keys[3], (D, D), dtype=jnp.float32) * 0.1
    wv = jax.random.normal(keys[4], (D, D), dtype=jnp.float32) * 0.1
    bv = jax.random.normal(keys[5], (D,), dtype=jnp.float32) * 0.1
    wo = jax.random.normal(keys[6], (D, D), dtype=jnp.float32) * 0.1
    bo = jax.random.normal(keys[7], (D,), dtype=jnp.float32) * 0.1

    out, qk = multi_head_attention(x, wq, bq, wk, wv, bv, wo, bo, n_head=H)
    jax.block_until_ready((out, qk))

    ref_out, ref_qk = _reference(x, wq, bq, wk, wv, bv, wo, bo, H)
    # qk has no approximate ops -> tight tolerance; out goes through the EUP
    # approximate reciprocal in the softmax -> slightly looser tolerance.
    assert jnp.allclose(qk, ref_qk, atol=1e-4, rtol=1e-4)
    assert jnp.allclose(out, ref_out, atol=2e-3, rtol=2e-3)

    print("KERNEL_OK")
</pallas_src>

<mosaic_0001>
module attributes {stable_mosaic.version = 11 : i64} {
  func.func @_mha_kernel(%arg0: i32, %arg1: i32, %arg2: memref<1x8x32xf32, #tpu.memory_space<vmem>>, %arg3: memref<1x32x24xf32, #tpu.memory_space<vmem>>, %arg4: memref<1x1x24xf32, #tpu.memory_space<vmem>>, %arg5: memref<1x8x32xf32, #tpu.memory_space<vmem>>, %arg6: memref<1x32xf32, #tpu.memory_space<vmem>>, %arg7: memref<1x8x32xf32, #tpu.memory_space<vmem>>, %arg8: memref<1x1x8x8xf32, #tpu.memory_space<vmem>>, %arg9: memref<8x32xf32, #tpu.memory_space<vmem>>) attributes {dimension_semantics = [#tpu.dimension_semantics<parallel>, #tpu.dimension_semantics<arbitrary>], iteration_bounds = array<i64: 2, 4>, scalar_prefetch = 0 : i64, scratch_operands = 1 : i64, tpu.core_type = #tpu.core_type<tc>, window_params = [{transform_indices = @transform_0, window_bounds = array<i64: 1, 8, 32>}, {transform_indices = @transform_1, window_bounds = array<i64: 1, 32, 24>}, {transform_indices = @transform_2, window_bounds = array<i64: 1, 1, 24>}, {transform_indices = @transform_3, window_bounds = array<i64: 1, 8, 32>}, {pipeline_mode = #tpu.pipeline_mode<synchronous>, transform_indices = @transform_4, window_bounds = array<i64: 1, 32>}, {transform_indices = @transform_5, window_bounds = array<i64: 1, 8, 32>}, {transform_indices = @transform_6, window_bounds = array<i64: 1, 1, 8, 8>}]} {
    %c0_i32 = arith.constant 0 : i32
    %0 = arith.cmpi eq, %arg1, %c0_i32 : i32
    %1 = arith.extui %0 : i1 to i32
    %c0_i32_0 = arith.constant 0 : i32
    %2 = arith.cmpi ne, %1, %c0_i32_0 : i32
    scf.if %2 {
      %cst_26 = arith.constant 0.000000e+00 : f32
      %40 = vector.broadcast %cst_26 : f32 to vector<8x32xf32>
      %c0_27 = arith.constant 0 : index
      %c0_28 = arith.constant 0 : index
      %41 = vector.load %arg9[%c0_27, %c0_28] : memref<8x32xf32, #tpu.memory_space<vmem>>, vector<8x32xf32>
      tpu.vector_store %arg9[%c0_27, %c0_28], %40 {strides = array<i32>} : memref<8x32xf32, #tpu.memory_space<vmem>>, vector<8x32xf32>,
    } else {
    }
    %c0 = arith.constant 0 : index
    %c0_1 = arith.constant 0 : index
    %c0_2 = arith.constant 0 : index
    %3 = vector.load %arg2[%c0, %c0_1, %c0_2] : memref<1x8x32xf32, #tpu.memory_space<vmem>>, vector<1x8x32xf32>
    %4 = vector.shape_cast %3 : vector<1x8x32xf32> to vector<8x32xf32>
    %c0_3 = arith.constant 0 : index
    %c0_4 = arith.constant 0 : index
    %c0_5 = arith.constant 0 : index
    %5 = vector.load %arg3[%c0_3, %c0_4, %c0_5] : memref<1x32x24xf32, #tpu.memory_space<vmem>>, vector<1x32x24xf32>
    %6 = vector.shape_cast %5 : vector<1x32x24xf32> to vector<32x24xf32>
    %cst = arith.constant dense<0.000000e+00> : vector<8x24xf32>
    %7 = tpu.matmul %4, %6, %cst {dimension_numbers = #tpu.dot_dimension_numbers<[1], [0], [0], [1], [0, 0, 1, 1], [], []>} : vector<8x32xf32>, vector<32x24xf32>, vector<8x24xf32> -> vector<8x24xf32>
    %c0_6 = arith.constant 0 : index
    %c0_7 = arith.constant 0 : index
    %c0_8 = arith.constant 0 : index
    %8 = vector.load %arg4[%c0_6, %c0_7, %c0_8] : memref<1x1x24xf32, #tpu.memory_space<vmem>>, vector<1x1x24xf32>
    %9 = vector.shape_cast %8 : vector<1x1x24xf32> to vector<24xf32>
    %10 = vector.shape_cast %9 : vector<24xf32> to vector<1x24xf32>
    %11 = vector.broadcast %10 : vector<1x24xf32> to vector<8x24xf32>
    %12 = arith.addf %7, %11 : vector<8x24xf32>
    %13 = vector.extract_strided_slice %12 {offsets = [0, 0], sizes = [8, 8], strides = [1, 1]} : vector<8x24xf32> to vector<8x8xf32>
    %14 = vector.extract_strided_slice %12 {offsets = [0, 8], sizes = [8, 8], strides = [1, 1]} : vector<8x24xf32> to vector<8x8xf32>
    %15 = vector.extract_strided_slice %12 {offsets = [0, 16], sizes = [8, 8], strides = [1, 1]} : vector<8x24xf32> to vector<8x8xf32>
    %cst_9 = arith.constant dense<0.000000e+00> : vector<8x8xf32>
    %16 = tpu.matmul %13, %14, %cst_9 {dimension_numbers = #tpu.dot_dimension_numbers<[1], [1], [0], [0], [0, 0, 1, 0], [], []>} : vector<8x8xf32>, vector<8x8xf32>, vector<8x8xf32> -> vector<8x8xf32>
    %c0_10 = arith.constant 0 : index
    %c0_11 = arith.constant 0 : index
    %c0_12 = arith.constant 0 : index
    %c0_13 = arith.constant 0 : index
    %17 = vector.load %arg8[%c0_10, %c0_11, %c0_12, %c0_13] : memref<1x1x8x8xf32, #tpu.memory_space<vmem>>, vector<1x1x8x8xf32>
    %18 = vector.shape_cast %17 : vector<1x1x8x8xf32> to vector<8x8xf32>
    %19 = vector.shape_cast %16 : vector<8x8xf32> to vector<1x1x8x8xf32>
    tpu.vector_store %arg8[%c0_10, %c0_11, %c0_12, %c0_13], %19 {strides = array<i32>} : memref<1x1x8x8xf32, #tpu.memory_space<vmem>>, vector<1x1x8x8xf32>,
    %cst_14 = arith.constant dense<0xFF800000> : vector<8xf32>
    %20 = vector.multi_reduction <maximumf>, %16, %cst_14 [1] : vector<8x8xf32> to vector<8xf32>
    %21 = vector.shape_cast %20 : vector<8xf32> to vector<8x1xf32>
    %22 = vector.broadcast %21 : vector<8x1xf32> to vector<8x8xf32>
    %23 = arith.subf %16, %22 : vector<8x8xf32>
    %24 = math.exp %23 : vector<8x8xf32>
    %cst_15 = arith.constant dense<0.000000e+00> : vector<8xf32>
    %25 = vector.multi_reduction <add>, %24, %cst_15 [1] : vector<8x8xf32> to vector<8xf32>
    %26 = vector.shape_cast %25 : vector<8xf32> to vector<8x1xf32>
    %27 = tpu.reciprocal %26 {approx = true} : vector<8x1xf32> -> vector<8x1xf32>
    %28 = vector.broadcast %27 : vector<8x1xf32> to vector<8x8xf32>
    %29 = arith.mulf %24, %28 : vector<8x8xf32>
    %cst_16 = arith.constant dense<0.000000e+00> : vector<8x8xf32>
    %30 = tpu.matmul %29, %15, %cst_16 {dimension_numbers = #tpu.dot_dimension_numbers<[1], [0], [0], [1], [0, 0, 1, 1], [], []>} : vector<8x8xf32>, vector<8x8xf32>, vector<8x8xf32> -> vector<8x8xf32>
    %c0_17 = arith.constant 0 : index
    %c0_18 = arith.constant 0 : index
    %31 = vector.load %arg9[%c0_17, %c0_18] : memref<8x32xf32, #tpu.memory_space<vmem>>, vector<8x32xf32>
    %c0_19 = arith.constant 0 : index
    %c0_20 = arith.constant 0 : index
    %c0_21 = arith.constant 0 : index
    %32 = vector.load %arg5[%c0_19, %c0_20, %c0_21] : memref<1x8x32xf32, #tpu.memory_space<vmem>>, vector<1x8x32xf32>
    %33 = vector.shape_cast %32 : vector<1x8x32xf32> to vector<8x32xf32>
    %cst_22 = arith.constant dense<0.000000e+00> : vector<8x32xf32>
    %34 = tpu.matmul %30, %33, %cst_22 {dimension_numbers = #tpu.dot_dimension_numbers<[1], [0], [0], [1], [0, 0, 1, 1], [], []>} : vector<8x8xf32>, vector<8x32xf32>, vector<8x32xf32> -> vector<8x32xf32>
    %35 = arith.addf %31, %34 : vector<8x32xf32>
    %c0_23 = arith.constant 0 : index
    %c0_24 = arith.constant 0 : index
    %36 = vector.load %arg9[%c0_23, %c0_24] : memref<8x32xf32, #tpu.memory_space<vmem>>, vector<8x32xf32>
    tpu.vector_store %arg9[%c0_23, %c0_24], %35 {strides = array<i32>} : memref<8x32xf32, #tpu.memory_space<vmem>>, vector<8x32xf32>,
    %c3_i32 = arith.constant 3 : i32
    %37 = arith.cmpi eq, %arg1, %c3_i32 : i32
    %38 = arith.extui %37 : i1 to i32
    %c0_i32_25 = arith.constant 0 : i32
    %39 = arith.cmpi ne, %38, %c0_i32_25 : i32
    scf.if %39 {
      %c0_26 = arith.constant 0 : index
      %c0_27 = arith.constant 0 : index
      %40 = vector.load %arg9[%c0_26, %c0_27] : memref<8x32xf32, #tpu.memory_space<vmem>>, vector<8x32xf32>
      %c0_28 = arith.constant 0 : index
      %c0_29 = arith.constant 0 : index
      %41 = vector.load %arg6[%c0_28, %c0_29] : memref<1x32xf32, #tpu.memory_space<vmem>>, vector<1x32xf32>
      %42 = vector.shape_cast %41 : vector<1x32xf32> to vector<32xf32>
      %43 = vector.shape_cast %42 : vector<32xf32> to vector<1x32xf32>
      %44 = vector.broadcast %43 : vector<1x32xf32> to vector<8x32xf32>
      %45 = arith.addf %40, %44 : vector<8x32xf32>
      %c0_30 = arith.constant 0 : index
      %c0_31 = arith.constant 0 : index
      %c0_32 = arith.constant 0 : index
      %46 = vector.load %arg7[%c0_30, %c0_31, %c0_32] : memref<1x8x32xf32, #tpu.memory_space<vmem>>, vector<1x8x32xf32>
      %47 = vector.shape_cast %46 : vector<1x8x32xf32> to vector<8x32xf32>
      %48 = vector.shape_cast %45 : vector<8x32xf32> to vector<1x8x32xf32>
      tpu.vector_store %arg7[%c0_30, %c0_31, %c0_32], %48 {strides = array<i32>} : memref<1x8x32xf32, #tpu.memory_space<vmem>>, vector<1x8x32xf32>,
    } else {
    }
    return
  }
  func.func @transform_0(%arg0: i32, %arg1: i32) -> (i32, i32, i32) {
    %c0_i32 = arith.constant 0 : i32
    %c0_i32_0 = arith.constant 0 : i32
    %c0_i32_1 = arith.constant 0 : i32
    return %arg0, %c0_i32, %c0_i32_0 : i32, i32, i32
  }
  func.func @transform_1(%arg0: i32, %arg1: i32) -> (i32, i32, i32) {
    %c0_i32 = arith.constant 0 : i32
    %c0_i32_0 = arith.constant 0 : i32
    %c0_i32_1 = arith.constant 0 : i32
    return %arg1, %c0_i32, %c0_i32_0 : i32, i32, i32
  }
  func.func @transform_2(%arg0: i32, %arg1: i32) -> (i32, i32, i32) {
    %c0_i32 = arith.constant 0 : i32
    %c0_i32_0 = arith.constant 0 : i32
    %c0_i32_1 = arith.constant 0 : i32
    return %arg1, %c0_i32, %c0_i32_0 : i32, i32, i32
  }
  func.func @transform_3(%arg0: i32, %arg1: i32) -> (i32, i32, i32) {
    %c0_i32 = arith.constant 0 : i32
    %c0_i32_0 = arith.constant 0 : i32
    %c0_i32_1 = arith.constant 0 : i32
    return %arg1, %c0_i32, %c0_i32_0 : i32, i32, i32
  }
  func.func @transform_4(%arg0: i32, %arg1: i32) -> (i32, i32) {
    %c0_i32 = arith.constant 0 : i32
    %c0_i32_0 = arith.constant 0 : i32
    %c0_i32_1 = arith.constant 0 : i32
    return %c0_i32, %c0_i32_0 : i32, i32
  }
  func.func @transform_5(%arg0: i32, %arg1: i32) -> (i32, i32, i32) {
    %c0_i32 = arith.constant 0 : i32
    %c0_i32_0 = arith.constant 0 : i32
    %c0_i32_1 = arith.constant 0 : i32
    return %arg0, %c0_i32, %c0_i32_0 : i32, i32, i32
  }
  func.func @transform_6(%arg0: i32, %arg1: i32) -> (i32, i32, i32, i32) {
    %c0_i32 = arith.constant 0 : i32
    %c0_i32_0 = arith.constant 0 : i32
    %c0_i32_1 = arith.constant 0 : i32
    return %arg0, %arg1, %c0_i32, %c0_i32_0 : i32, i32, i32, i32
  }
}

</mosaic_0001>

<bundles_post_ra>
// kernel: tpu_custom_call.1
= control target key start
LH: loop header
LB: loop body
LE: loop exit
PB: predicated region body
PF: predicated region fallthrough
CT: control target
= control target key end

     0   :  { %s1211_s0 = inlined_call_operand.vmem [shape: f32[2,8,32], index: 0, kind: input, shape index: {}]   ;;  %s1212_s1 = inlined_call_operand.vmem [shape: f32[4,32,24], index: 1, kind: input, shape index: {}]   ;;  %s1213_s2 = inlined_call_operand.vmem [shape: f32[4,1,24], index: 2, kind: input, shape index: {}]   ;;  %s1214_s3 = inlined_call_operand.vmem [shape: f32[4,8,32], index: 3, kind: input, shape index: {}]   ;;  %s1215_s4 = inlined_call_operand.vmem [shape: f32[1,32], index: 4, kind: input, shape index: {}]   ;;  %s1216_s5 = inlined_call_operand.hbm [shape: f32[2,8,32], index: 5, kind: output, shape index: {0}]   ;;  %s1217_s6 = inlined_call_operand.hbm [shape: f32[2,4,8,8], index: 6, kind: output, shape index: {1}]  }
   0x1   :  { %1235 = sst [smem:[#allocation23_spill]] %s1217_s6 }
   0x2   :  { %12 = vsyncpa [#allocation4], 0 }
   0x3   :  { %14 = vsyncpa [#allocation4 + $0x1], 0 }
   0x4   :  { %15 = vsyncpa [#allocation6], 0 }
   0x5   :  { %17 = vsyncpa [#allocation6 + $0x1], 0  ;;  %s966_s21 = smov 0   ;;  %s968_s22 = smov 0  }
   0x6   :  { %s970_s23 = smov 0   ;;  %s972_s24 = smov 0  }
   0x7   :  { %s974_s25 = smov 0   ;;  %s976_s26 = smov 0  }
   0x8   :  { %s978_s27 = smov 0   ;;  %s980_s28 = smov 0  }
   0x9   :  { %s982_s29 = smov 0   ;;  %s984_s30 = smov 0  }
   0xa   :  { %s986_s7 = smov 0  }
   0xb LB: > { %1236 = sst [smem:[#allocation9_spill]] %s886_s21  ;;  %s641_s8 = sadd.s32 4294967295, %s926_s7   ;;  %s926_s7 = sphi %s986_s7, %s23_s7   ;;  %s922_s30 = sphi %s984_s30, %s1272_s30   ;;  %s918_s29 = sphi %s982_s29, %s1271_s29   ;;  %s914_s28 = sphi %s980_s28, %s1270_s28   ;;  %s910_s27 = sphi %s978_s27, %s1269_s27   ;;  %s906_s26 = sphi %s976_s26, %s1277_s26   ;;  %s902_s25 = sphi %s974_s25, %s1276_s25   ;;  %s898_s24 = sphi %s972_s24, %s1275_s24   ;;  %s894_s23 = sphi %s970_s23, %s1266_s23   ;;  %s890_s22 = sphi %s968_s22, %s1274_s22   ;;  %s886_s21 = sphi %s966_s21, %s1273_s21  }
   0xc   : > { %1237 = sst [smem:[#allocation10_spill]] %s894_s23  ;;  %s642_s9 = sadd.s32 4294967294, %s926_s7  }
   0xd   : > { %1238 = sst [smem:[#allocation11_spill]] %s898_s24  ;;  %s32_s10 = sadd.s32 1, %s918_s29 }
   0xe   : > { %1239 = sst [smem:[#allocation12_spill]] %s906_s26  ;;  %s35_s11 = sadd.s32 1, %s922_s30 }
   0xf   : > { %1240 = sst [smem:[#allocation13_spill]] %s918_s29  ;;  %p33_p0 = scmp.ge.s32.totalorder %s32_s10, 4 }
  0x10   : > { %1241 = sst [smem:[#allocation14_spill]] %s922_s30  ;;  %s167_s12 = sadd.s32 1, %s906_s26 }
  0x11   : > { %1242 = sst [smem:[#allocation15_spill]] %s926_s7  ;;  %p177_p1 = scmp.ne.s32.totalorder %s906_s26, %s902_s25 }
  0x12   : > { %p1028_p2 = scmp.eq.s32.totalorder %s641_s8, 7  ;;  %s1279_s10 = smov (%p33_p0, %s32_s10), 0 }
  0x13   : > { %1244 = sst [smem:[#allocation16_spill]] %s1279_s10  ;;  %s1281_s11 = smov (!%p33_p0, %s35_s11), %s922_s30 }
  0x14   : > { %p1037_p3 = por %p1028_p2, %p177_p1  ;;  %p183_p4 = scmp.ne.s32.totalorder %s902_s25, %s898_s24 }
  0x15   : > { %p37_p5 = scmp.ge.s32.totalorder %s1281_s11, 2  ;;  %p1043_p6 = scmp.eq.s32.totalorder %s642_s9, 7 }
  0x16   : > { %s191_s16 = ssub.s32 %s918_s29, %s1279_s10  ;;  %s195_s17 = sadd.s32 1, %s894_s23 }
  0x17   : > { %s1283_s11 = smov (%p37_p5, %s1281_s11), 0  ;;  %p1054_p7 = por %p1043_p6, %p183_p4 }
  0x18   : > { %1247 = sst [smem:[#allocation17_spill]] %s1283_s11  ;;  %p205_p8 = scmp.ne.s32.totalorder %s894_s23, %s890_s22 }
  0x19   : > { %s1248_s18 = scalar_select %p1054_p7, 1, 0 }
  0x1a   : > { %s164_s19 = ssub.s32 %s922_s30, %s1283_s11  ;;  %p211_p9 = scmp.ne.s32.totalorder %s890_s22, %s886_s21 }
  0x1b   : > { %1249 = sst [smem:[#allocation18_spill]] %s1248_s18  ;;  %p165_p10 = scmp.eq.s32.totalorder %s164_s19, 0 }
  0x1c   : > { %s192_s20 = sor.u32 %s191_s16, %s164_s19  ;;  %p1066_p12 = por %p205_p8, %p1028_p2 }
  0x1d   : > { %p193_p11 = scmp.eq.s32.totalorder %s192_s20, 0  ;;  %p1078_p13 = por %p211_p9, %p1043_p6 }
  0x1e   : > { %s1250_s8 = scalar_select %p1066_p12, 1, 0 }
  0x1f   : > { %s1071_s9 = scalar_select %p165_p10, %s906_s26, %s167_s12  }
  0x20   : > { %1251 = sst [smem:[#allocation19_spill]] %s1250_s8  ;;  %p645_p0 = scmp.ge.s32.totalorder %s926_s7, 1 }
  0x21   : > { %1252 = sst [smem:[#allocation20_spill]] %s1071_s9  ;;  %p261_p1 = scmp.lt.s32.totalorder %s926_s7, 9 }
  0x22   : > { %s1074_s10 = scalar_select %p193_p11, %s894_s23, %s195_s17  }
  0x23   : > { %s1254_s29 = scalar_select %p1078_p13, 1, 0 }
  0x24   : > { %1253 = sst [smem:[#allocation21_spill]] %s1074_s10  ;;  %p262_p4 = pnand %p645_p0, %p261_p1 }
  0x25   : > { %1255 = sst [smem:[#allocation22_spill]] %s1254_s29  ;;  %s1224_s12 = sand.u32 (!%p262_p4), 1, %s902_s25  }
  0x26   : > { %265 = sbr.rel (%p262_p4) target bundleno = 1018 (0x3fa), region = 40  ;;  %s1227_s13 = sand.u32 (!%p262_p4), 1, %s890_s22  }
  0x27   : > { %s1088_s15 = sshll.u32 (!%p262_p4), %s1224_s12, 3  ;;  %s1092_s16 = sshll.u32 (!%p262_p4), %s1227_s13, 3 }
  0x28   : > { %p307_p2 = scmp.lt.s32.totalorder (!%p262_p4), %s914_s28, 1  ;;  %p311_p5 = scmp.lt.s32.totalorder (!%p262_p4), %s910_s27, 3 }
  0x29   : > { %s306_s8 = scalar_lea.vmem (!%p262_p4), [#allocation5], %s1092_s16  ;;  %p652_p6 = scmp.ne.s32.totalorder (!%p262_p4), %s910_s27, 0 }
  0x2b   : > { %s308_s17 = scalar_select %p307_p2, %s914_s28, 1 }
  0x2c   : > { %s312_s19 = scalar_select %p311_p5, %s910_s27, 3 }
  0x2d   : > { %s648_s20 = sshll.u32 %s308_s17, 3  ;;  %s299_s17 = scalar_lea.vmem [#allocation3], %s1088_s15 }
  0x2e   : > { %s310_s9 = scalar_lea.vmem %s1211_s0, %s648_s20  ;;  %s666_s26 = sshll.u32 %s312_s19, 5 }
  0x2f   : > { %s315_s12 = scalar_lea.vmem %s1212_s1, %s666_s26  ;;  %s318_s13 = scalar_lea.vmem %s1213_s2, %s312_s19 }
  0x30   : > { %s651_s18 = sshll.u32 %s312_s19, 3  ;;  %326 = sbr.rel (%p652_p6) target bundleno = 55 (0x37), region = 44 }
  0x31   : > { %s1110_s6 = scalar_lea.vmem %s1214_s3, %s651_s18 }
  0x35   : > { %vm327_vm0 = vcmask 261120   ;;  %v928_v0 = vmov 0.0  }
  0x36   : > { %328 = vst.msk [vmem:[#allocation2] sm:$0xff] %vm327_vm0, %v928_v0 }
  0x37 PF: > { %v333_v1 = vld [vmem:[%s315_s12 + $0x18] sm:$0xff]  ;;  %v332_v2 = vld [vmem:[%s315_s12 + $0x10] sm:$0xff]  ;;  %v331_v3 = vld [vmem:[%s315_s12 + $0x8] sm:$0xff]  ;;  %vm338_vm1 = vcmask 261120   ;;  %s929_s21 = smov 120   ;;  %vm365_vm2 = vcmask 64512  }
  0x38   : > { %354 = vmatpush.msra.mxu0 %v333_v1  ;;  %v330_v4 = vld [vmem:[%s315_s12] sm:$0xff]  ;;  %s930_s23 = smov 112   ;;  %p658_p8 = scmp.ne.s32.totalorder %s910_s27, 3 }
  0x39   : > { %v329_v5 = vld [vmem:[%s310_s9] sm:$0xff] }
  0x3a   : > { %355 = vmatpush.msra.mxu0 %v332_v2  ;;  %v770_v6 = vld [vmem:[%s318_s13] ss:$0 sm:$0xff] }
  0x3b   : > { %v429_v21 = vld [vmem:[%s1110_s6] sm:$0xff] }
  0x3c   : > { %356 = vmatpush.msra.mxu0 %v331_v3  ;;  %448 = vmatpush.msra.mxu3 %v429_v21 }
  0x3d   : > { %v428_v23 = vld [vmem:[#allocation2] sm:$0xff] }
  0x3e   : > { %357 = vmatpush.msra.mxu0 %v330_v4 }
  0x3f   : > { %653 = vmatmul.msk.f32.vlgmr.msra.gmra.mxu0 %vm338_vm1, %v329_v5 }
  0xbc   : > { %v359_v7 = vpop.f32.mrf.mxu0 }
  0xbd   : > { %v360_v8 = vadd.f32 %v770_v6, %v359_v7 }
  0xbf   : > { %363 = vrot.lane.b32.xlu0 %v360_v8, %s929_s21 }
 0x131   : > { %v364_v9 = vpop.permute.xlu0 %363 }
 0x132   : > { %654 = vmatpush.xpose.msk.msra.mxu1 %vm365_vm2, %v364_v9 }
 0x135   : > { %655 = vmatmul.msk.f32.vlgmr.msra.gmra.mxu1 %vm365_vm2, %v360_v8 }
 0x1b2   : > { %v387_v10 = vpop.f32.mrf.mxu1 }
 0x1b3   : > { %390 = vst.msk [vmem:[%s306_s8] sm:$0xff] %vm365_vm2, %v387_v10  ;;  %v391_v11 = vsel %vm365_vm2, %v387_v10, -inf }
 0x1b4   : > { %392 = vmax.xlane.f32.xlu0 %v391_v11 }
 0x227   : > { %v393_v12 = vpop.xlane.xlu0 %392 }
 0x228   : > { %v394_v13 = vsub.f32 %v387_v10, %v393_v12 }
 0x22a   : > { %v395_v14 = vmul.f32 1.442695, %v394_v13 }
 0x22c   : > { %771 = vpow2.f32 %v395_v14 }
 0x232   : > { %v772_v15 = vpop.eup %771 }
 0x233   : > { %v397_v16 = vsel %vm365_vm2, %v772_v15, 0.0 }
 0x234   : > { %398 = vadd.xlane.f32.xlu1 %v397_v16 }
 0x24d   : > { %402 = vrot.lane.b32.xlu1 %v360_v8, %s930_s23 }
 0x2a7   : > { %v399_v17 = vpop.xlane.xlu1 %398 }
 0x2a8   : > { %773 = vrcp.f32 %v399_v17 }
 0x2ae   : > { %v774_v18 = vpop.eup %773 }
 0x2af   : > { %v401_v20 = vmul.f32 %v774_v18, %v772_v15 }
 0x2bf   : > { %v403_v19 = vpop.permute.xlu1 %402 }
 0x2c0   : > { %423 = vmatpush.msra.mxu2 %v403_v19 }
 0x2c1   : > { %656 = vmatmul.msk.f32.vlgmr.msra.gmra.mxu2 %vm365_vm2, %v401_v20 }
 0x344   : > { %v425_v22 = vpop.f32.mrf.mxu2 }
 0x345   : > { %657 = vmatmul.msk.f32.vlgmr.msra.gmra.mxu3 %vm365_vm2, %v425_v22 }
 0x3c7   : > { %458 = sbr.rel (%p658_p8) target bundleno = 982 (0x3d6), region = 48 }
 0x3c8   : > { %v450_v24 = vpop.f32.mrf.mxu3 }
 0x3c9   : > { %v453_v25 = vadd.f32 %v450_v24, %v428_v23 }
 0x3cb   : > { %454 = vst.msk [vmem:[#allocation2] sm:$0xff] %vm338_vm1, %v453_v25 }
 0x3cc   : > { %v775_v27 = vld [vmem:[%s1215_s4] ss:$0 sm:$0xff] }
 0x3d2   : > { %v459_v26 = vld [vmem:[#allocation2] sm:$0xff] }
 0x3d3   : > { %v464_v28 = vadd.f32 %v775_v27, %v459_v26 }
 0x3d5   : > { %465 = vst.msk [vmem:[%s299_s17] sm:$0xff] %vm338_vm1, %v464_v28 }
 0x3d6 PF: > { %s661_s6 = sshll.u32 %s914_s28, 3  ;;  %s484_s10 = sshll.u32 %s299_s17, 4  ;;  %s485_s10 = int_to_ptr.vmem [resolvable:$true] %s484_s10 }
 0x3d7   : > { %s482_s7 = scalar_lea.hbm %s1216_s5, %s661_s6  ;;  %s1256_s18 = sand.u32 1, %s902_s25  }
 0x3d8   : > { %s486_s11 = sshll.u32 %s482_s7, 4  ;;  %s467_s9 = scalar_lea.sflag [#allocation4], %s1256_s18  ;;  %s487_s11 = int_to_ptr.hbm [resolvable:$true] %s486_s11 }
 0x3d9   : > { %s790_s12 = sshra.s32 %s487_s11, 4  ;;  %s796_s21 = scalar_lea.hbm %s1216_s5, 16  ;;  %s791_s12 = int_to_ptr.hbm [resolvable:$true] %s790_s12 }
 0x3da   : > { %s792_s13 = scalar_lea.hbm %s791_s12, 8  ;;  %p797_p0 = scmp.lt.s32.totalorder %s791_s12, %s1216_s5 }
 0x3db   : > { %p793_p9 = scmp.ne.s32.totalorder %s791_s12, %s792_s13  ;;  %p798_p1 = scmp.lt.s32.totalorder %s796_s21, %s792_s13 }
 0x3dd   : > { %p794_p10 = pnand %p793_p9, %p1037_p3  ;;  %p799_p4 = por %p798_p1, %p797_p0 }
 0x3df   : > { %p795_p11 = pneg %p794_p10 }
 0x3e1   : > { %p800_p2 = pnand %p799_p4, %p795_p11 }
 0x3e3   : > { %803 = shalt.err (!%p800_p2)
}
 0x3e4   : > { %667 = dma.vmem_to_hbm [thread:$0]  (%p1037_p3), %s485_s10, 128, %s487_s11, %s467_s9  }
 0x3e5   : > { %s662_s17 = sshll.u32 %s914_s28, 2  ;;  %s500_s26 = sshll.u32 %s306_s8, 4  ;;  %s501_s26 = int_to_ptr.vmem [resolvable:$true] %s500_s26 }
 0x3e6   : > { %s496_s6 = sadd.s32 %s910_s27, %s662_s17  ;;  %s1258_s18 = sld [smem:[#allocation23_spill]] }
 0x3e7   : > { %s663_s29 = sshll.u32 %s496_s6, 3  ;;  %s1259_s19 = sand.u32 1, %s890_s22  }
 0x3e8   : > { %s472_s14 = scalar_lea.sflag [#allocation6], %s1259_s19 }
 0x3ec   : > { %s498_s12 = scalar_lea.hbm %s1258_s18, %s663_s29  ;;  %s824_s27 = scalar_lea.hbm %s1258_s18, 64 }
 0x3ed   : > { %s502_s13 = sshll.u32 %s498_s12, 4  ;;  %s503_s13 = int_to_ptr.hbm [resolvable:$true] %s502_s13 }
 0x3ee   : > { %s818_s20 = sshra.s32 %s503_s13, 4  ;;  %s819_s20 = int_to_ptr.hbm [resolvable:$true] %s818_s20 }
 0x3ef   : > { %s820_s21 = scalar_lea.hbm %s819_s20, 8  ;;  %p825_p8 = scmp.lt.s32.totalorder %s819_s20, %s1258_s18 }
 0x3f0   : > { %p821_p5 = scmp.ne.s32.totalorder %s819_s20, %s820_s21  ;;  %p826_p9 = scmp.lt.s32.totalorder %s824_s27, %s820_s21 }
 0x3f2   : > { %p822_p3 = pnand %p821_p5, %p1066_p12  ;;  %p827_p10 = por %p826_p9, %p825_p8 }
 0x3f4   : > { %p823_p6 = pneg %p822_p3 }
 0x3f6   : > { %p828_p11 = pnand %p827_p10, %p823_p6 }
 0x3f8   : > { %831 = shalt.err (!%p828_p11)
}
 0x3f9   : > { %668 = dma.vmem_to_hbm [thread:$0]  (%p1066_p12), %s501_s26, 128, %s503_s13, %s472_s14  }
 0x3fa PF: > { %s1260_s11 = sld [smem:[#allocation15_spill]] }
 0x3fb   : > { %s1261_s9 = sld [smem:[#allocation11_spill]] }
 0x400   : > { %p678_p0 = scmp.ge.s32.totalorder %s1260_s11, 2 }
 0x401   : > { %s514_s24 = sand.u32 1, %s1261_s9  }
 0x402   : > { %p672_p1 = pnand %p678_p0, %p1054_p7  ;;  %s515_s17 = scalar_lea.sflag [#allocation4], %s514_s24 }
 0x404   : > { %p673_p4 = pneg %p672_p1 }
 0x406   : > { %877 = dma.done.wait (%p673_p4), %s515_s17, 128  }
 0x407   : > { %879 = vsyncadd (%p673_p4), %s515_s17, 4294967168  ;;  %s1263_s6 = sld [smem:[#allocation9_spill]]  ;;  %p675_p2 = pnand %p678_p0, %p1078_p13 }
 0x409   : > { %p676_p5 = pneg %p675_p2 }
 0x40d   : > { %s524_s30 = sand.u32 1, %s1263_s6  }
 0x40e   : > { %s525_s15 = scalar_lea.sflag [#allocation6], %s524_s30 }
 0x40f   : > { %881 = dma.done.wait (%p676_p5), %s525_s15, 128  }
 0x410   : > { %883 = vsyncadd (%p676_p5), %s525_s15, 4294967168  ;;  %s23_s7 = sadd.s32 1, %s1260_s11   ;;  %s1265_s26 = sld [smem:[#allocation10_spill]] }
 0x411   : > { %p20_p12 = scmp.ge.s32.totalorder %s23_s7, 10   ;;  %s1266_s23 = sld [smem:[#allocation21_spill]] }
 0x412   : > { %s1267_s12 = sld [smem:[#allocation12_spill]]  ;;  %s1273_s21 = smov %s890_s22 }
 0x413   : > { %s1268_s13 = sld [smem:[#allocation20_spill]]  ;;  %s1275_s24 = smov %s902_s25 }
 0x414   : > { %s1269_s27 = sld [smem:[#allocation13_spill]] }
 0x415   : > { %s1270_s28 = sld [smem:[#allocation14_spill]]  ;;  %22 = sbr.rel (!%p20_p12) target bundleno = 11 (0xb), region = 109 }
 0x416   : > { %s1271_s29 = sld [smem:[#allocation16_spill]]  ;;  %s1274_s22 = smov %s1265_s26 }
 0x417   : > { %s1272_s30 = sld [smem:[#allocation17_spill]] }
 0x418   : > { %s1276_s25 = smov %s1267_s12 }
 0x419   : > { %s1277_s26 = smov %s1268_s13 }
 0x41a   :  { %531 = vsyncpa [#allocation4], 1 }
 0x41b   :  { %533 = vsyncpa [#allocation4 + $0x1], 1 }
 0x41c   :  { %534 = vsyncpa [#allocation6], 1 }
 0x41d   :  { %536 = vsyncpa [#allocation6 + $0x1], 1 }

</bundles_post_ra>
